<compile_context>
chip_gen: v5e
topology: v5e:2x2
jax: 0.10.0
libtpu: 0.0.40
codegen_flags: <defaults>
</compile_context>

<pallas_src>
import functools

import jax
import jax.numpy as jnp
from jax.experimental import pallas as pl
from jax.experimental.pallas import tpu as pltpu


def _t2v_kernel(tau_t_ref, wt_ref, b_ref, mask_ref, o_ref, *, f):
    # z = W^T @ tau^T + bias  -> (O, B_tile), f32 accumulation on the MXU.
    z = jnp.dot(wt_ref[...], tau_t_ref[...],
                preferred_element_type=jnp.float32)
    z = z + b_ref[...]                                    # (O,1) lane-broadcast
    # Precomputed mask: 1.0 on periodic rows, 0.0 on the final linear row.
    m = jnp.broadcast_to(mask_ref[...], z.shape) != 0.0
    o_ref[...] = jnp.where(m, f(z), z).astype(o_ref.dtype)


def pack_time2vec_params(w, b, w0, b0):
    """Pack parameters once (hoisted out of the per-call forward path).

    Returns (wt, bias, mask):
      wt   (O, F) = [w | w0]^T   (last row is the linear "time" row)
      bias (O, 1) = [b ; b0]
      mask (O, 1) = 1.0 for periodic rows, 0.0 for the final linear row
    """
    wt = jnp.concatenate([w, w0], axis=1).T.astype(jnp.float32)        # (O, F)
    bias = jnp.concatenate([b, b0], axis=0).astype(jnp.float32)[:, None]
    out_f = wt.shape[0]
    mask = (jnp.arange(out_f) < out_f - 1).astype(jnp.float32)[:, None]  # (O,1)
    return wt, bias, mask


def time2vec_forward(tau, packed, *, means="sine", block_b=1024, io_dtype=None):
    """Pallas Time2Vec forward.  tau: (B, in_features) -> (B, out_features)."""
    wt, bias, mask = packed
    B, in_f = tau.shape
    out_f = wt.shape[0]
    f = jnp.sin if means == "sine" else jnp.cos

    # Batch tiling: a single full block if it fits, else pad B to a multiple
    # of block_b (block_b is a multiple of 128 -> lane rule satisfied).
    if B <= block_b:
        tb, b_pad = B, B
    else:
        tb = block_b
        b_pad = -(-B // tb) * tb

    tau_p = tau if b_pad == B else jnp.pad(tau, ((0, b_pad - B), (0, 0)))
    tau_t = tau_p.T                                   # (F, B_pad), lane-dense

    out_dtype = tau.dtype
    if io_dtype is not None:      # e.g. jnp.bfloat16 on v6e/v7x: halves HBM bytes
        tau_t = tau_t.astype(io_dtype)
        wt = wt.astype(io_dtype)
        out_dtype = io_dtype

    cost = pl.CostEstimate(
        flops=2 * B * in_f * out_f,
        transcendentals=B * (out_f - 1),
        bytes_accessed=4 * (B * in_f + in_f * out_f + B * out_f),
    )

    out_t = pl.pallas_call(
        functools.partial(_t2v_kernel, f=f),
        out_shape=jax.ShapeDtypeStruct((out_f, b_pad), out_dtype),
        grid=(b_pad // tb,),
        in_specs=[
            pl.BlockSpec((in_f, tb), lambda i: (0, i)),   # tau^T, tiled batch
            pl.BlockSpec((out_f, in_f), lambda i: (0, 0)),  # packed W^T
            pl.BlockSpec((out_f, 1), lambda i: (0, 0)),     # packed bias
            pl.BlockSpec((out_f, 1), lambda i: (0, 0)),     # periodic-row mask
        ],
        out_specs=pl.BlockSpec((out_f, tb), lambda i: (0, i)),
        compiler_params=pltpu.CompilerParams(
            dimension_semantics=("parallel",)),
        cost_estimate=cost,
    )(tau_t, wt, bias, mask)

    return out_t[:, :B].T                              # back to (B, out_features)


def time2vec_reference(tau, w, b, w0, b0, means="sine"):
    f = jnp.sin if means == "sine" else jnp.cos
    v1 = f(tau @ w + b)
    v2 = tau @ w0 + b0
    return jnp.concatenate([v1, v2], axis=-1)


if __name__ == "__main__":
    in_features, out_features, batch = 4, 8, 8

    key = jax.random.PRNGKey(0)
    k_tau, k_w0, k_b0, k_w, k_b, k_tau2 = jax.random.split(key, 6)

    tau = jax.random.normal(k_tau, (batch, in_features), dtype=jnp.float32)
    w0 = jax.random.normal(k_w0, (in_features, 1), dtype=jnp.float32)
    b0 = jax.random.normal(k_b0, (1,), dtype=jnp.float32)
    w = jax.random.normal(k_w, (in_features, out_features - 1), dtype=jnp.float32)
    b = jax.random.normal(k_b, (out_features - 1,), dtype=jnp.float32)

    # Packing is hoisted: done once at "parameter init", reused per forward.
    packed = pack_time2vec_params(w, b, w0, b0)

    # Case 1: small batch (single full-dim block).
    out = jax.block_until_ready(time2vec_forward(tau, packed))
    ref = time2vec_reference(tau, w, b, w0, b0)
    assert out.shape == (batch, out_features)
    assert jnp.allclose(out, ref, atol=1e-5, rtol=1e-5), "mismatch (small batch)"

    # Case 2: batch not divisible by the tile -> exercises grid + padding path.
    batch2 = 300
    tau2 = jax.random.normal(k_tau2, (batch2, in_features), dtype=jnp.float32)
    out2 = jax.block_until_ready(time2vec_forward(tau2, packed, block_b=128))
    ref2 = time2vec_reference(tau2, w, b, w0, b0)
    assert out2.shape == (batch2, out_features)
    assert jnp.allclose(out2, ref2, atol=1e-5, rtol=1e-5), "mismatch (tiled batch)"

    print("KERNEL_OK")
</pallas_src>

<mosaic_0001>
module attributes {stable_mosaic.version = 11 : i64} {
  func.func @_t2v_kernel(%arg0: i32, %arg1: memref<4x8xf32, #tpu.memory_space<vmem>>, %arg2: memref<8x4xf32, #tpu.memory_space<vmem>>, %arg3: memref<8x1xf32, #tpu.memory_space<vmem>>, %arg4: memref<8x1xf32, #tpu.memory_space<vmem>>, %arg5: memref<8x8xf32, #tpu.memory_space<vmem>>) attributes {dimension_semantics = [#tpu.dimension_semantics<parallel>], iteration_bounds = array<i64: 1>, scalar_prefetch = 0 : i64, scratch_operands = 0 : i64, tpu.core_type = #tpu.core_type<tc>, window_params = [{transform_indices = @transform_0, window_bounds = array<i64: 4, 8>}, {pipeline_mode = #tpu.pipeline_mode<synchronous>, transform_indices = @transform_1, window_bounds = array<i64: 8, 4>}, {pipeline_mode = #tpu.pipeline_mode<synchronous>, transform_indices = @transform_2, window_bounds = array<i64: 8, 1>}, {pipeline_mode = #tpu.pipeline_mode<synchronous>, transform_indices = @transform_3, window_bounds = array<i64: 8, 1>}, {transform_indices = @transform_4, window_bounds = array<i64: 8, 8>}]} {
    %c0 = arith.constant 0 : index
    %c0_0 = arith.constant 0 : index
    %0 = vector.load %arg2[%c0, %c0_0] : memref<8x4xf32, #tpu.memory_space<vmem>>, vector<8x4xf32>
    %c0_1 = arith.constant 0 : index
    %c0_2 = arith.constant 0 : index
    %1 = vector.load %arg1[%c0_1, %c0_2] : memref<4x8xf32, #tpu.memory_space<vmem>>, vector<4x8xf32>
    %cst = arith.constant dense<0.000000e+00> : vector<8x8xf32>
    %2 = tpu.matmul %0, %1, %cst {dimension_numbers = #tpu.dot_dimension_numbers<[1], [0], [0], [1], [0, 0, 1, 1], [], []>} : vector<8x4xf32>, vector<4x8xf32>, vector<8x8xf32> -> vector<8x8xf32>
    %c0_3 = arith.constant 0 : index
    %c0_4 = arith.constant 0 : index
    %3 = vector.load %arg3[%c0_3, %c0_4] : memref<8x1xf32, #tpu.memory_space<vmem>>, vector<8x1xf32>
    %4 = vector.broadcast %3 : vector<8x1xf32> to vector<8x8xf32>
    %5 = arith.addf %2, %4 : vector<8x8xf32>
    %c0_5 = arith.constant 0 : index
    %c0_6 = arith.constant 0 : index
    %6 = vector.load %arg4[%c0_5, %c0_6] : memref<8x1xf32, #tpu.memory_space<vmem>>, vector<8x1xf32>
    %7 = vector.shape_cast %6 : vector<8x1xf32> to vector<8x1xf32>
    %8 = vector.broadcast %7 : vector<8x1xf32> to vector<8x8xf32>
    %cst_7 = arith.constant 0.000000e+00 : f32
    %9 = vector.broadcast %cst_7 : f32 to vector<8x8xf32>
    %10 = arith.cmpf one, %8, %9 : vector<8x8xf32>
    %11 = math.sin %5 : vector<8x8xf32>
    %12 = arith.select %10, %11, %5 : vector<8x8xi1>, vector<8x8xf32>
    %c0_8 = arith.constant 0 : index
    %c0_9 = arith.constant 0 : index
    %13 = vector.load %arg5[%c0_8, %c0_9] : memref<8x8xf32, #tpu.memory_space<vmem>>, vector<8x8xf32>
    tpu.vector_store %arg5[%c0_8, %c0_9], %12 {strides = array<i32>} : memref<8x8xf32, #tpu.memory_space<vmem>>, vector<8x8xf32>,
    return
  }
  func.func @transform_0(%arg0: i32) -> (i32, i32) {
    %c0_i32 = arith.constant 0 : i32
    %c0_i32_0 = arith.constant 0 : i32
    return %c0_i32, %arg0 : i32, i32
  }
  func.func @transform_1(%arg0: i32) -> (i32, i32) {
    %c0_i32 = arith.constant 0 : i32
    %c0_i32_0 = arith.constant 0 : i32
    %c0_i32_1 = arith.constant 0 : i32
    return %c0_i32, %c0_i32_0 : i32, i32
  }
  func.func @transform_2(%arg0: i32) -> (i32, i32) {
    %c0_i32 = arith.constant 0 : i32
    %c0_i32_0 = arith.constant 0 : i32
    %c0_i32_1 = arith.constant 0 : i32
    return %c0_i32, %c0_i32_0 : i32, i32
  }
  func.func @transform_3(%arg0: i32) -> (i32, i32) {
    %c0_i32 = arith.constant 0 : i32
    %c0_i32_0 = arith.constant 0 : i32
    %c0_i32_1 = arith.constant 0 : i32
    return %c0_i32, %c0_i32_0 : i32, i32
  }
  func.func @transform_4(%arg0: i32) -> (i32, i32) {
    %c0_i32 = arith.constant 0 : i32
    %c0_i32_0 = arith.constant 0 : i32
    return %c0_i32, %arg0 : i32, i32
  }
}

</mosaic_0001>

<bundles_post_ra>
// kernel: tpu_custom_call.1
= control target key start
LH: loop header
LB: loop body
LE: loop exit
PB: predicated region body
PF: predicated region fallthrough
CT: control target
= control target key end

     0   :  { %vm30_vm0 = vcmask 1043456   ;;  %vm26_vm1 = vcmask 31744   ;;  %v275_v2 = vmov 0   ;;  %s383_s0 = inlined_call_operand.vmem [shape: f32[4,8], index: 0, kind: input, shape index: {}]   ;;  %s384_s1 = inlined_call_operand.vmem [shape: f32[8,4], index: 1, kind: input, shape index: {}]   ;;  %s385_s2 = inlined_call_operand.vmem [shape: f32[8,1], index: 2, kind: input, shape index: {}]   ;;  %s386_s3 = inlined_call_operand.vmem [shape: f32[8,1], index: 3, kind: input, shape index: {}]   ;;  %s387_s4 = inlined_call_operand.hbm [shape: f32[8,8], index: 4, kind: output, shape index: {}]  }
   0x1   :  { %v19_v0 = vld [vmem:[%s383_s0] sm:$0xf]  ;;  %248 = vset.pattern.permute.xlu0 %v275_v2 }
   0x2   :  { %v18_v1 = vld [vmem:[%s384_s1] sm:$0xff]  ;;  %235 = vmatpush.msk.msra.mxu0 %vm30_vm0, %v19_v0 }
   0x3   :  { %v20_v3 = vld [vmem:[%s385_s2] sm:$0xff] }
   0x4   :  { %9 = vsyncpa [#allocation3], 0  ;;  %236 = vmatmul.msk.f32.vlgmr.msra.gmra.mxu0 %vm26_vm1, %v18_v1  ;;  %23 = vperm.xlu0 %248, %v20_v3   ;;  %v54_v4 = vld [vmem:[%s386_s3] sm:$0xff]  ;;  %v276_v19 = vmov 2102212464   ;;  %s282_s0 = smov [#allocation2]  }
   0x5   :  { %v277_v21 = vmov 920167782   ;;  %v278_v24 = vmov 1326507024   ;;  %v279_v26 = vmov 683565275  }
   0x6   :  { %v280_v28 = vmov 2475754826   ;;  %v281_v31 = vmov 2131351028   ;;  %s224_s1 = sshll.u32 %s282_s0, 4  ;;  %s226_s23 = sshll.u32 %s387_s4, 4  ;;  %s225_s1 = int_to_ptr.vmem [resolvable:$true] %s224_s1  ;;  %s227_s23 = int_to_ptr.hbm [resolvable:$true] %s226_s23 }
   0xc   :  { %57 = vperm.xlu0 %248, %v54_v4  }
  0x76   :  { %v24_v5 = vpop.permute.xlu0 %23 }
  0x81   :  { %v51_v6 = vpop.f32.mrf.mxu0 }
  0x82   :  { %v321_v7 = vadd.f32 %v51_v6, %v24_v5 }
  0x84   :  { %v64_v8 = vand.u32 2139095040, %v321_v7  ;;  %v61_v11 = vand.u32 2147483647, %v321_v7  ;;  %vm63_vm14 = vcmp.lt.s32.totalorder %v321_v7, 0 }
  0x86   :  { %v65_v9 = vshrl.u32 %v64_v8, 23  ;;  %v68_v13 = vand.u32 8388607, %v61_v11  ;;  %vm62_vm15 = vcmp.le.f32.partialorder %v61_v11, 0.7853982 }
  0x88   :  { %v237_v10 = vadd.s32 4294967169, %v65_v9  ;;  %v69_v17 = vor.u32 8388608, %v68_v13 }
  0x8a   :  { %v71_v12 = vadd.s32 1, %v237_v10  ;;  %v336_v38 = vshll.u32 %v69_v17, 8 }
  0x8c   :  { %vm72_vm2 = vcmp.gt.s32.totalorder %v71_v12, 0  ;;  %v110_v48 = vand.u32 65535, %v336_v38  ;;  %v111_v50 = vshrl.u32 %v336_v38, 16 }
  0x8d   :  { %v73_v14 = vsel %vm72_vm2, %v71_v12, 0 }
  0x8e   :  { %v75_v15 = vand.u32 31, %v73_v14  ;;  %v329_v18 = vshrl.u32 %v73_v14, 5 }
  0x90   :  { %v327_v16 = vsub.s32 32, %v75_v15  ;;  %v87_v20 = vshll.u32 %v276_v19, %v75_v15  ;;  %v90_v22 = vshll.u32 %v277_v21, %v75_v15  ;;  %v78_v27 = vshll.u32 %v279_v26, %v75_v15 }
  0x91   :  { %v81_v30 = vshll.u32 %v280_v28, %v75_v15  ;;  %v84_v33 = vshll.u32 %v281_v31, %v75_v15  ;;  %vm96_vm3 = vcmp.lt.s32.totalorder %v329_v18, 4  ;;  %vm93_vm4 = vcmp.lt.s32.totalorder %v329_v18, 1 }
  0x92   :  { %v88_v23 = vshrl.u32 %v277_v21, %v327_v16  ;;  %v91_v25 = vshrl.u32 %v278_v24, %v327_v16  ;;  %v79_v29 = vshrl.u32 %v280_v28, %v327_v16  ;;  %v82_v32 = vshrl.u32 %v281_v31, %v327_v16 }
  0x93   :  { %v85_v34 = vshrl.u32 %v276_v19, %v327_v16  ;;  %vm95_vm5 = vcmp.lt.s32.totalorder %v329_v18, 3  ;;  %vm94_vm6 = vcmp.lt.s32.totalorder %v329_v18, 2  ;;  %v77_v12 = vshrl.u32 %v279_v26, %v327_v16 }
  0x94   :  { %v89_v35 = vor.u32 %v88_v23, %v87_v20  ;;  %v92_v36 = vor.u32 %v91_v25, %v90_v22  ;;  %v80_v37 = vor.u32 %v79_v29, %v78_v27  ;;  %v83_v39 = vor.u32 %v82_v32, %v81_v30 }
  0x95   :  { %v86_v40 = vor.u32 %v85_v34, %v84_v33 }
  0x96   :  { %v102_v41 = vsel %vm96_vm3, %v89_v35, 920167782  ;;  %v106_v42 = vsel %vm96_vm3, %v92_v36, 1326507024  ;;  %v101_v43 = vsel %vm93_vm4, %v80_v37, %v83_v39  ;;  %v97_v20 = vsel %vm93_vm4, %v77_v12, %v80_v37 }
  0x97   :  { %v103_v44 = vsel %vm95_vm5, %v86_v40, %v102_v41  ;;  %v105_v45 = vsel %vm93_vm4, %v83_v39, %v86_v40  ;;  %v107_v47 = vsel %vm95_vm5, %v89_v35, %v106_v42  ;;  %v98_v8 = vsel %vm96_vm3, %v86_v40, 2102212464 }
  0x98   :  { %v104_v46 = vsel %vm94_vm6, %v101_v43, %v103_v44  ;;  %v108_v49 = vsel %vm94_vm6, %v105_v45, %v107_v47  ;;  %v99_v21 = vsel %vm95_vm5, %v83_v39, %v98_v8  ;;  %vm204_vm3 = vweird.f32 %v321_v7 }
  0x99   :  { %v134_v51 = vand.u32 65535, %v104_v46  ;;  %v135_v52 = vshrl.u32 %v104_v46, 16  ;;  %v112_v53 = vand.u32 65535, %v108_v49  ;;  %v113_v54 = vshrl.u32 %v108_v49, 16 }
  0x9a   :  { %v100_v26 = vsel %vm94_vm6, %v97_v20, %v99_v21  ;;  %vm217_vm4 = vcmask 64512  }
  0x9b   :  { %v137_v55 = vmul.u32 %v135_v52, %v110_v48  ;;  %v138_v56 = vmul.u32 %v134_v51, %v111_v50  ;;  %v115_v57 = vmul.u32 %v113_v54, %v110_v48  ;;  %v116_v58 = vmul.u32 %v112_v53, %v111_v50 }
  0x9c   :  { %v136_v59 = vmul.u32 %v134_v51, %v110_v48  ;;  %v114_v61 = vmul.u32 %v112_v53, %v110_v48  ;;  %v139_v63 = vmul.u32 %v135_v52, %v111_v50  ;;  %v117_v0 = vmul.u32 %v113_v54, %v111_v50 }
  0x9d   :  { %v140_v60 = vshll.u32 %v137_v55, 16  ;;  %v118_v62 = vshll.u32 %v115_v57, 16  ;;  %v142_v1 = vshll.u32 %v138_v56, 16  ;;  %v120_v4 = vshll.u32 %v116_v58, 16 }
  0x9e   :  { %v141_v17 = vshrl.u32 %v137_v55, 16  ;;  %v119_v22 = vshrl.u32 %v115_v57, 16  ;;  %v143_v24 = vshrl.u32 %v138_v56, 16  ;;  %v121_v27 = vshrl.u32 %v116_v58, 16 }
  0x9f   :  { %vm144_vm7 = vc.u32 %v136_v59, %v140_v60  ;;  %v146_v3 = vadd.s32 %v140_v60, %v136_v59  ;;  %vm122_vm8 = vc.u32 %v114_v61, %v118_v62  ;;  %v124_v5 = vadd.s32 %v118_v62, %v114_v61 }
  0xa0   :  { %v145_v6 = vsel %vm144_vm7, 1, %v275_v2  ;;  %v123_v9 = vsel %vm122_vm8, 1, %v275_v2  ;;  %v154_v31 = vmul.u32 %v336_v38, %v100_v26 }
  0xa1   :  { %v147_v10 = vadd.s32 %v145_v6, %v139_v63  ;;  %vm148_vm9 = vc.u32 %v146_v3, %v142_v1  ;;  %v125_v13 = vadd.s32 %v123_v9, %v117_v0  ;;  %vm126_vm10 = vc.u32 %v124_v5, %v120_v4 }
  0xa2   :  { %v149_v14 = vsel %vm148_vm9, 1, %v275_v2  ;;  %v127_v15 = vsel %vm126_vm10, 1, %v275_v2  ;;  %v150_v2 = vadd.s32 %v146_v3, %v142_v1 }
  0xa3   :  { %v151_v19 = vadd.s32 %v149_v14, %v147_v10  ;;  %v129_v23 = vadd.s32 %v127_v15, %v125_v13 }
  0xa5   :  { %v152_v25 = vadd.s32 %v151_v19, %v141_v17  ;;  %v130_v16 = vadd.s32 %v129_v23, %v119_v22  ;;  %v58_v17 = vpop.permute.xlu0 %57 }
  0xa6   :  { %vm60_vm5 = vcmp.ne.f32.partialorder %v58_v17, 0.0 }
  0xa7   :  { %v153_v28 = vadd.s32 %v152_v25, %v143_v24  ;;  %v131_v29 = vadd.s32 %v130_v16, %v121_v27 }
  0xa9   :  { %v157_v30 = vadd.s32 1, %v153_v28  ;;  %vm156_vm11 = vc.u32 %v131_v29, %v150_v2  ;;  %v155_v43 = vadd.s32 %v150_v2, %v131_v29 }
  0xab   :  { %v158_v32 = vsel %vm156_vm11, %v157_v30, %v153_v28 }
  0xac   :  { %v159_v33 = vadd.s32 %v158_v32, %v154_v31 }
  0xae   :  { %v160_v34 = vadd.s32 536870912, %v159_v33 }
  0xb0   :  { %v161_v35 = vshrl.u32 %v160_v34, 30 }
  0xb2   :  { %v162_v36 = vshll.u32 %v161_v35, 30  ;;  %v185_v56 = vsub.s32 4, %v161_v35 }
  0xb4   :  { %v163_v37 = vsub.s32 %v159_v33, %v162_v36  ;;  %v186_v61 = vsel %vm63_vm14, %v185_v56, %v161_v35 }
  0xb5   :  { %v188_v0 = vsel %vm62_vm15, 0, %v186_v61 }
  0xb6   :  { %vm164_vm12 = vcmp.lt.s32.totalorder %v163_v37, 0  ;;  %v165_v39 = vsub.s32 0, %v163_v37  ;;  %v205_v6 = vadd.s32 3, %v188_v0 }
  0xb8   :  { %v166_v40 = vsel %vm164_vm12, %v165_v39, %v163_v37  ;;  %v206_v12 = vand.u32 3, %v205_v6 }
  0xb9   :  { %v167_v41 = vclz %v166_v40 }
  0xba   :  { %vm208_vm0 = vcmp.eq.s32.totalorder %v206_v12, 0  ;;  %vm211_vm1 = vcmp.eq.s32.totalorder %v206_v12, 2  ;;  %vm207_vm2 = vcmp.lt.s32.totalorder %v206_v12, 2 }
  0xbb   :  { %v238_v42 = vadd.s32 4294967294, %v167_v41 }
  0xbd   :  { %vm239_vm13 = vcmp.lt.s32.totalorder %v238_v42, 0 }
  0xbe   :  { %v170_v18 = vsel %vm239_vm13, 0, %v238_v42 }
  0xbf   :  { %v171_v44 = vsub.s32 32, %v170_v18  ;;  %v175_v45 = vsub.s32 4294967266, %v170_v18  ;;  %v172_v46 = vshll.u32 %v163_v37, %v170_v18 }
  0xc1   :  { %v173_v47 = vshrl.u32 %v155_v43, %v171_v44  ;;  %v176_v38 = vadd.s32 127, %v175_v45 }
  0xc3   :  { %v174_v48 = vor.u32 %v173_v47, %v172_v46  ;;  %v177_v49 = vshll.u32 %v176_v38, 23 }
  0xc5   :  { %v178_v50 = vor.u32 4788187, %v177_v49  ;;  %v181_v52 = vcvt.s32.f32 %v174_v48 }
  0xc7   :  { %v179_v51 = vand.u32 2147483647, %v178_v50 }
  0xc9   :  { %v182_v53 = vmul.f32 %v181_v52, %v179_v51 }
  0xcb   :  { %v183_v54 = vxor.u32 2147483648, %v182_v53 }
  0xcd   :  { %v184_v55 = vsel %vm63_vm14, %v183_v54, %v182_v53 }
  0xce   :  { %v187_v57 = vsel %vm62_vm15, %v321_v7, %v184_v55 }
  0xcf   :  { %v189_v58 = vmul.f32 %v187_v57, %v187_v57 }
  0xd1   :  { %v190_v59 = vmul.f32 -0.001358992, %v189_v58  ;;  %v197_v60 = vmul.f32 -0.00019511016, %v189_v58 }
  0xd3   :  { %v191_v62 = vadd.f32 0.041655596, %v190_v59  ;;  %v198_v63 = vadd.f32 0.008332121, %v197_v60 }
  0xd5   :  { %v192_v1 = vmul.f32 %v191_v62, %v189_v58  ;;  %v199_v3 = vmul.f32 %v198_v63, %v189_v58 }
  0xd7   :  { %v193_v4 = vadd.f32 -0.4999988, %v192_v1  ;;  %v200_v5 = vadd.f32 -0.16666654, %v199_v3 }
  0xd9   :  { %v194_v8 = vmul.f32 %v193_v4, %v189_v58  ;;  %v201_v9 = vmul.f32 %v200_v5, %v189_v58 }
  0xdb   :  { %v195_v10 = vadd.f32 1.0, %v194_v8  ;;  %v202_v11 = vadd.f32 1.0, %v201_v9 }
  0xdd   :  { %v203_v13 = vmul.f32 %v202_v11, %v187_v57  ;;  %v212_v14 = vxor.u32 2147483648, %v195_v10 }
  0xdf   :  { %v209_v15 = vxor.u32 2147483648, %v203_v13  ;;  %v213_v20 = vsel %vm211_vm1, %v212_v14, %v203_v13 }
  0xe1   :  { %v210_v19 = vsel %vm208_vm0, %v195_v10, %v209_v15 }
  0xe2   :  { %v214_v21 = vsel %vm207_vm2, %v210_v19, %v213_v20 }
  0xe3   :  { %v215_v22 = vsel %vm204_vm3, nan, %v214_v21 }
  0xe4   :  { %v216_v23 = vsel %vm60_vm5, %v215_v22, %v321_v7 }
  0xe5   :  { %218 = vst.msk [vmem:[#allocation2] sm:$0xff] %vm217_vm4, %v216_v23 }
  0xe6   :  { %229 = dma.vmem_to_hbm [thread:$0]  %s225_s1, 128, %s227_s23, [#allocation3]  }
  0xe7   :  { %273 = dma.done.wait [#allocation3], 128  }
  0xe8   :  { %274 = vsyncadd [#allocation3], 4294967168 }
  0xe9   :  { %234 = vsyncpa [#allocation3], 1 }

</bundles_post_ra>
